<compile_context>
chip_gen: v7x
topology: tpu7x:2x2x1
jax: 0.10.0
libtpu: 0.0.40
codegen_flags: <defaults>
</compile_context>

<pallas_src>
import jax
import jax.numpy as jnp
from jax import lax
from jax.experimental import pallas as pl
from jax.experimental.pallas import tpu as pltpu

BN_EPS = 1e-5


def _round_up(x, m):
    return (x + m - 1) // m * m


def _vmem_limit_bytes():
    # v5e/v6e: 128 MiB physical -> 64 MiB scoped; v7x: 64 MiB -> 32 MiB.
    try:
        cap = int(pltpu.get_tpu_info().vmem_capacity_bytes)
    except Exception:   # info query unavailable -> assume the smallest (v7x)
        cap = 64 << 20
    return int(min(64 << 20, cap // 2))


def downsample_layer(x_nchw, weight_oihw, gamma, beta):
    """Forward pass of DownsampleLayer (conv3x3 s2 p1 no-bias + BatchNorm2d)."""
    n, cin, h, w = x_nchw.shape
    cout = weight_oihw.shape[0]
    ho = (h + 2 - 3) // 2 + 1
    wo = (w + 2 - 3) // 2 + 1
    m_img = ho * wo                    # output positions per image
    k3 = 3 * cin                       # per-height-tap contraction size
    coutp = _round_up(cout, 128)       # lane-dense output slab

    # ---- wrapper glue (cheap, ~1 fused XLA pass over the input) ------------
    # NCHW f32 -> NHWC bf16, pad spatially by 1, pre-gather the 3 width taps
    # into the lane dim (kw-major, cin-minor), split rows by parity and
    # flatten (rows, Wo) so the height taps become contiguous row-offset
    # slices inside the kernel.  No 9x im2col is materialized in HBM.
    x = jnp.transpose(x_nchw, (0, 2, 3, 1)).astype(jnp.bfloat16)   # [N,H,W,Cin]
    xp = jnp.pad(x, ((0, 0), (1, 1), (1, 1), (0, 0)))              # [N,H+2,W+2,Cin]
    xw = jnp.concatenate(
        [xp[:, :, kw:kw + 2 * wo:2, :] for kw in range(3)], axis=-1
    )                                                              # [N,H+2,Wo,3Cin]
    x_even = xw[:, 0:2 * ho + 1:2].reshape(n, (ho + 1) * wo, k3)   # rows 0,2,..,2Ho
    x_odd = xw[:, 1:2 * ho:2].reshape(n, m_img, k3)                # rows 1,3,..,2Ho-1

    # conv weight: OIHW -> [kh, kw*Cin + cin, CoutP] bf16, zero-padded channels
    w_taps = jnp.transpose(weight_oihw, (2, 3, 1, 0)).reshape(3, k3, cout)
    w_taps = jnp.pad(
        w_taps, ((0, 0), (0, 0), (0, coutp - cout))).astype(jnp.bfloat16)

    # ---- fused conv + BN-statistics kernel, grid over the batch ------------
    def kernel(xe_ref, xo_ref, w_ref, y_ref, s_ref, ss_ref):
        # height tap kh=0: even rows ho     -> flat [0, m_img)
        # height tap kh=1: odd  rows ho     -> flat [0, m_img)
        # height tap kh=2: even rows ho + 1 -> flat [wo, wo + m_img)
        x0 = xe_ref[0, 0:m_img, :]
        x1 = xo_ref[0, :, :]
        x2 = xe_ref[0, wo:wo + m_img, :]
        acc = jnp.dot(x0, w_ref[0], preferred_element_type=jnp.float32)
        acc = acc + jnp.dot(x1, w_ref[1], preferred_element_type=jnp.float32)
        acc = acc + jnp.dot(x2, w_ref[2], preferred_element_type=jnp.float32)
        y_ref[...] = acc[None, :, :].astype(y_ref.dtype)           # bf16 out
        s_ref[...] = jnp.sum(acc, axis=0)[None, None, :]           # f32 stats
        ss_ref[...] = jnp.sum(acc * acc, axis=0)[None, None, :]

    cost = pl.CostEstimate(
        flops=2 * n * m_img * (9 * cin) * coutp,
        transcendentals=0,
        bytes_accessed=(n * (ho + 1) * wo * k3 * 2 + n * m_img * k3 * 2
                        + 3 * k3 * coutp * 2 + n * m_img * coutp * 2
                        + 2 * n * coutp * 4),
    )

    y, psum, psumsq = pl.pallas_call(
        kernel,
        out_shape=(
            jax.ShapeDtypeStruct((n, m_img, coutp), jnp.bfloat16),
            jax.ShapeDtypeStruct((n, 1, coutp), jnp.float32),
            jax.ShapeDtypeStruct((n, 1, coutp), jnp.float32),
        ),
        grid_spec=pltpu.PrefetchScalarGridSpec(
            num_scalar_prefetch=0,
            grid=(n,),
            in_specs=[
                pl.BlockSpec((1, (ho + 1) * wo, k3), lambda i: (i, 0, 0)),
                pl.BlockSpec((1, m_img, k3), lambda i: (i, 0, 0)),
                # constant block index -> resident weight, single-buffered
                pl.BlockSpec((3, k3, coutp), lambda i: (0, 0, 0),
                             pipeline_mode=pl.Buffered(1)),
            ],
            out_specs=[
                pl.BlockSpec((1, m_img, coutp), lambda i: (i, 0, 0)),
                pl.BlockSpec((1, 1, coutp), lambda i: (i, 0, 0)),
                pl.BlockSpec((1, 1, coutp), lambda i: (i, 0, 0)),
            ],
        ),
        compiler_params=pltpu.CompilerParams(
            dimension_semantics=("parallel",),
            vmem_limit_bytes=_vmem_limit_bytes(),
        ),
        cost_estimate=cost,
    )(x_even, x_odd, w_taps)

    # ---- finalize batch statistics (tiny, f32) ------------------------------
    m_total = n * m_img
    total_s = jnp.sum(psum[:, 0, :cout], axis=0)
    total_ss = jnp.sum(psumsq[:, 0, :cout], axis=0)
    mean = total_s / m_total
    var = jnp.maximum(total_ss / m_total - mean * mean, 0.0)   # biased variance
    inv = lax.rsqrt(var + BN_EPS)
    scale = gamma.astype(jnp.float32) * inv
    shift = beta.astype(jnp.float32) - mean * scale

    # ---- BN apply folded into the slice + NCHW transpose epilogue -----------
    out = y[:, :, :cout].astype(jnp.float32) * scale + shift
    out = out.reshape(n, ho, wo, cout)
    return jnp.transpose(out, (0, 3, 1, 2))                    # back to NCHW


def _reference(x_nchw, weight_oihw, gamma, beta):
    y = lax.conv_general_dilated(
        x_nchw, weight_oihw,
        window_strides=(2, 2),
        padding=((1, 1), (1, 1)),
        dimension_numbers=("NCHW", "OIHW", "NCHW"),
    )
    mean = jnp.mean(y, axis=(0, 2, 3), keepdims=True)
    var = jnp.mean(jnp.square(y - mean), axis=(0, 2, 3), keepdims=True)
    return (y - mean) * lax.rsqrt(var + BN_EPS) * gamma.reshape(1, -1, 1, 1) \
        + beta.reshape(1, -1, 1, 1)


if __name__ == "__main__":
    key = jax.random.PRNGKey(0)
    k_x, k_w, k_g, k_b = jax.random.split(key, 4)

    N, Cin, H, W = 2, 4, 16, 16
    Cout = 8

    x = jax.random.normal(k_x, (N, Cin, H, W), dtype=jnp.float32)
    # deterministic synthetic params (shapes match nn.Conv2d / BatchNorm2d)
    weight = jax.random.normal(k_w, (Cout, Cin, 3, 3), dtype=jnp.float32) * 0.1
    gamma = 1.0 + 0.1 * jax.random.normal(k_g, (Cout,), dtype=jnp.float32)
    beta = 0.1 * jax.random.normal(k_b, (Cout,), dtype=jnp.float32)

    fwd = jax.jit(downsample_layer)
    out = jax.block_until_ready(fwd(x, weight, gamma, beta))

    ref = _reference(x, weight, gamma, beta)
    assert out.shape == (N, Cout, H // 2, W // 2), out.shape
    # bf16 MXU inputs + bf16 intermediate (f32 accumulation and statistics):
    # compare to the f32 reference at a bf16-level tolerance.
    err = float(jnp.max(jnp.abs(out - ref)))
    assert err < 5e-2, f"mismatch vs reference: {err}"

    print("KERNEL_OK")
</pallas_src>

<mosaic_0001>
module attributes {stable_mosaic.version = 11 : i64} {
  func.func @kernel(%arg0: i32, %arg1: memref<1x72x12xbf16, #tpu.memory_space<vmem>>, %arg2: memref<1x64x12xbf16, #tpu.memory_space<vmem>>, %arg3: memref<3x12x128xbf16, #tpu.memory_space<vmem>>, %arg4: memref<1x64x128xbf16, #tpu.memory_space<vmem>>, %arg5: memref<1x1x128xf32, #tpu.memory_space<vmem>>, %arg6: memref<1x1x128xf32, #tpu.memory_space<vmem>>) attributes {dimension_semantics = [#tpu.dimension_semantics<parallel>], iteration_bounds = array<i64: 2>, scalar_prefetch = 0 : i64, scratch_operands = 0 : i64, tpu.core_type = #tpu.core_type<tc>, window_params = [{transform_indices = @transform_0, window_bounds = array<i64: 1, 72, 12>}, {transform_indices = @transform_1, window_bounds = array<i64: 1, 64, 12>}, {pipeline_mode = #tpu.pipeline_mode<synchronous>, transform_indices = @transform_2, window_bounds = array<i64: 3, 12, 128>}, {transform_indices = @transform_3, window_bounds = array<i64: 1, 64, 128>}, {transform_indices = @transform_4, window_bounds = array<i64: 1, 1, 128>}, {transform_indices = @transform_5, window_bounds = array<i64: 1, 1, 128>}]} {
    %c0 = arith.constant 0 : index
    %c0_0 = arith.constant 0 : index
    %c0_1 = arith.constant 0 : index
    %0 = vector.load %arg1[%c0, %c0_0, %c0_1] : memref<1x72x12xbf16, #tpu.memory_space<vmem>>, vector<1x64x12xbf16>
    %1 = vector.shape_cast %0 : vector<1x64x12xbf16> to vector<64x12xbf16>
    %c0_2 = arith.constant 0 : index
    %c0_3 = arith.constant 0 : index
    %c0_4 = arith.constant 0 : index
    %2 = vector.load %arg2[%c0_2, %c0_3, %c0_4] : memref<1x64x12xbf16, #tpu.memory_space<vmem>>, vector<1x64x12xbf16>
    %3 = vector.shape_cast %2 : vector<1x64x12xbf16> to vector<64x12xbf16>
    %c0_5 = arith.constant 0 : index
    %c8 = arith.constant 8 : index
    %c0_6 = arith.constant 0 : index
    %4 = vector.load %arg1[%c0_5, %c8, %c0_6] : memref<1x72x12xbf16, #tpu.memory_space<vmem>>, vector<1x64x12xbf16>
    %5 = vector.shape_cast %4 : vector<1x64x12xbf16> to vector<64x12xbf16>
    %c0_7 = arith.constant 0 : index
    %c0_8 = arith.constant 0 : index
    %c0_9 = arith.constant 0 : index
    %6 = vector.load %arg3[%c0_7, %c0_8, %c0_9] : memref<3x12x128xbf16, #tpu.memory_space<vmem>>, vector<1x12x128xbf16>
    %7 = vector.shape_cast %6 : vector<1x12x128xbf16> to vector<12x128xbf16>
    %cst = arith.constant dense<0.000000e+00> : vector<64x128xf32>
    %8 = tpu.matmul %1, %7, %cst {dimension_numbers = #tpu.dot_dimension_numbers<[1], [0], [0], [1], [0, 0, 1, 1], [], []>} : vector<64x12xbf16>, vector<12x128xbf16>, vector<64x128xf32> -> vector<64x128xf32>
    %c1 = arith.constant 1 : index
    %c0_10 = arith.constant 0 : index
    %c0_11 = arith.constant 0 : index
    %9 = vector.load %arg3[%c1, %c0_10, %c0_11] : memref<3x12x128xbf16, #tpu.memory_space<vmem>>, vector<1x12x128xbf16>
    %10 = vector.shape_cast %9 : vector<1x12x128xbf16> to vector<12x128xbf16>
    %cst_12 = arith.constant dense<0.000000e+00> : vector<64x128xf32>
    %11 = tpu.matmul %3, %10, %cst_12 {dimension_numbers = #tpu.dot_dimension_numbers<[1], [0], [0], [1], [0, 0, 1, 1], [], []>} : vector<64x12xbf16>, vector<12x128xbf16>, vector<64x128xf32> -> vector<64x128xf32>
    %12 = arith.addf %8, %11 : vector<64x128xf32>
    %c2 = arith.constant 2 : index
    %c0_13 = arith.constant 0 : index
    %c0_14 = arith.constant 0 : index
    %13 = vector.load %arg3[%c2, %c0_13, %c0_14] : memref<3x12x128xbf16, #tpu.memory_space<vmem>>, vector<1x12x128xbf16>
    %14 = vector.shape_cast %13 : vector<1x12x128xbf16> to vector<12x128xbf16>
    %cst_15 = arith.constant dense<0.000000e+00> : vector<64x128xf32>
    %15 = tpu.matmul %5, %14, %cst_15 {dimension_numbers = #tpu.dot_dimension_numbers<[1], [0], [0], [1], [0, 0, 1, 1], [], []>} : vector<64x12xbf16>, vector<12x128xbf16>, vector<64x128xf32> -> vector<64x128xf32>
    %16 = arith.addf %12, %15 : vector<64x128xf32>
    %17 = vector.shape_cast %16 : vector<64x128xf32> to vector<1x64x128xf32>
    %18 = arith.truncf %17 : vector<1x64x128xf32> to vector<1x64x128xbf16>
    %c0_16 = arith.constant 0 : index
    %c0_17 = arith.constant 0 : index
    %c0_18 = arith.constant 0 : index
    %19 = vector.load %arg4[%c0_16, %c0_17, %c0_18] : memref<1x64x128xbf16, #tpu.memory_space<vmem>>, vector<1x64x128xbf16>
    tpu.vector_store %arg4[%c0_16, %c0_17, %c0_18], %18 {strides = array<i32>} : memref<1x64x128xbf16, #tpu.memory_space<vmem>>, vector<1x64x128xbf16>,
    %cst_19 = arith.constant dense<0.000000e+00> : vector<128xf32>
    %20 = vector.multi_reduction <add>, %16, %cst_19 [0] : vector<64x128xf32> to vector<128xf32>
    %21 = vector.shape_cast %20 : vector<128xf32> to vector<1x1x128xf32>
    %c0_20 = arith.constant 0 : index
    %c0_21 = arith.constant 0 : index
    %c0_22 = arith.constant 0 : index
    %22 = vector.load %arg5[%c0_20, %c0_21, %c0_22] : memref<1x1x128xf32, #tpu.memory_space<vmem>>, vector<1x1x128xf32>
    tpu.vector_store %arg5[%c0_20, %c0_21, %c0_22], %21 {strides = array<i32>} : memref<1x1x128xf32, #tpu.memory_space<vmem>>, vector<1x1x128xf32>,
    %23 = arith.mulf %16, %16 : vector<64x128xf32>
    %cst_23 = arith.constant dense<0.000000e+00> : vector<128xf32>
    %24 = vector.multi_reduction <add>, %23, %cst_23 [0] : vector<64x128xf32> to vector<128xf32>
    %25 = vector.shape_cast %24 : vector<128xf32> to vector<1x1x128xf32>
    %c0_24 = arith.constant 0 : index
    %c0_25 = arith.constant 0 : index
    %c0_26 = arith.constant 0 : index
    %26 = vector.load %arg6[%c0_24, %c0_25, %c0_26] : memref<1x1x128xf32, #tpu.memory_space<vmem>>, vector<1x1x128xf32>
    tpu.vector_store %arg6[%c0_24, %c0_25, %c0_26], %25 {strides = array<i32>} : memref<1x1x128xf32, #tpu.memory_space<vmem>>, vector<1x1x128xf32>,
    return
  }
  func.func @transform_0(%arg0: i32) -> (i32, i32, i32) {
    %c0_i32 = arith.constant 0 : i32
    %c0_i32_0 = arith.constant 0 : i32
    %c0_i32_1 = arith.constant 0 : i32
    return %arg0, %c0_i32, %c0_i32_0 : i32, i32, i32
  }
  func.func @transform_1(%arg0: i32) -> (i32, i32, i32) {
    %c0_i32 = arith.constant 0 : i32
    %c0_i32_0 = arith.constant 0 : i32
    %c0_i32_1 = arith.constant 0 : i32
    return %arg0, %c0_i32, %c0_i32_0 : i32, i32, i32
  }
  func.func @transform_2(%arg0: i32) -> (i32, i32, i32) {
    %c0_i32 = arith.constant 0 : i32
    %c0_i32_0 = arith.constant 0 : i32
    %c0_i32_1 = arith.constant 0 : i32
    %c0_i32_2 = arith.constant 0 : i32
    return %c0_i32, %c0_i32_0, %c0_i32_1 : i32, i32, i32
  }
  func.func @transform_3(%arg0: i32) -> (i32, i32, i32) {
    %c0_i32 = arith.constant 0 : i32
    %c0_i32_0 = arith.constant 0 : i32
    %c0_i32_1 = arith.constant 0 : i32
    return %arg0, %c0_i32, %c0_i32_0 : i32, i32, i32
  }
  func.func @transform_4(%arg0: i32) -> (i32, i32, i32) {
    %c0_i32 = arith.constant 0 : i32
    %c0_i32_0 = arith.constant 0 : i32
    %c0_i32_1 = arith.constant 0 : i32
    return %arg0, %c0_i32, %c0_i32_0 : i32, i32, i32
  }
  func.func @transform_5(%arg0: i32) -> (i32, i32, i32) {
    %c0_i32 = arith.constant 0 : i32
    %c0_i32_0 = arith.constant 0 : i32
    %c0_i32_1 = arith.constant 0 : i32
    return %arg0, %c0_i32, %c0_i32_0 : i32, i32, i32
  }
}

</mosaic_0001>

<bundles_post_ra>
// kernel: downsample_layer.1
= control target key start
LH: loop header
LB: loop body
LE: loop exit
PB: predicated region body
PF: predicated region fallthrough
CT: control target
= control target key end

     0   :  { %s1005_s18 = smov 0   ;;  %s1086_s0 = inlined_call_operand.vmem [shape: bf16[2,72,12], index: 0, kind: input, shape index: {}]   ;;  %s1087_s1 = inlined_call_operand.vmem [shape: bf16[2,64,12], index: 1, kind: input, shape index: {}]   ;;  %s1088_s2 = inlined_call_operand.vmem [shape: bf16[3,12,128], index: 2, kind: input, shape index: {}]   ;;  %s1089_s3 = inlined_call_operand.vmem [shape: bf16[2,64,128], index: 3, kind: output, shape index: {0}]   ;;  %s1090_s4 = inlined_call_operand.vmem [shape: f32[2,1,128], index: 4, kind: output, shape index: {1}]   ;;  %s1091_s5 = inlined_call_operand.vmem [shape: f32[2,1,128], index: 5, kind: output, shape index: {2}]  }
   0x1 LB: > { %s792_s19 = sadd.s32 4294967295, %s973_s18   ;;  %p796_p0 = scmp.ge.s32.totalorder %s973_s18, 1  ;;  %s973_s18 = sphi %s1005_s18, %s16_s18  }
   0x2   : > { %p202_p1 = scmp.lt.s32.totalorder %s973_s18, 3 }
   0x4   : > { %p203_p2 = pnand %p796_p0, %p202_p1 }
   0x5   : > { %v952_v0 = vld [vmem:[%s1088_s2 + $0x8] sm:$0x3f] (!%p203_p2)   ;;  %vm323_vm0 = vcmask (!%p203_p2), 1045504   ;;  %p241_p3 = scmp.lt.s32.totalorder (!%p203_p2), %s792_s19, 1  ;;  %v953_v1 = vld [vmem:[%s1088_s2] sm:$0x3f] (!%p203_p2)  }
   0x6   : > { %206 = sbr.rel (%p203_p2) target bundleno = 279 (0x117), region = 32  ;;  %939 = vmatprep.subr.msk.bf16.mxu1 (!%p203_p2), %vm323_vm0, %v952_v0  ;;  %v325_v2 = vsel (!%p203_p2), %vm323_vm0, %v952_v0, 0  ;;  %v960_v3 = vld [vmem:[%s1088_s2 + $0x10] sm:$0x3f] (!%p203_p2)   ;;  %940 = vmatprep.subr.msk.bf16.mxu0 (!%p203_p2), %vm323_vm0, %v953_v1  ;;  %v430_v4 = vsel (!%p203_p2), %vm323_vm0, %v953_v1, 0  ;;  %vm310_vm1 = vcmask (!%p203_p2), 97280  }
   0x7   : > { %892 = vmatpush3.bf16.msra.mxu1 (!%p203_p2), %v325_v2  ;;  %902 = vmatpush3.bf16.msra.mxu0 (!%p203_p2), %v430_v4  ;;  %v524_v14 = vsel (!%p203_p2), %vm323_vm0, %v960_v3, 0 }
   0x8   : > { %941 = vmatprep.subr.msk.bf16.mxu1 (!%p203_p2), %vm323_vm0, %v953_v1  ;;  %942 = vmatprep.subr.msk.bf16.mxu0 (!%p203_p2), %vm323_vm0, %v960_v3 }
   0xd   : > { %s1093_s19 = smov (!%p241_p3, %s792_s19), 1 }
   0xe   : > { %s843_s26 = sshll.u32 %s1093_s19, 5  ;;  %s943_s27 = smul.u32 36, %s1093_s19 }
   0xf   : > { %s250_s30 = scalar_lea.vmem %s1087_s1, %s843_s26  ;;  %s1069_s11 = scalar_lea.vmem %s1089_s3, %s843_s26 }
  0x10   : > { %v954_v5 = vld [vmem:[%s250_s30] sm:$0xff]   ;;  %s1040_s8 = scalar_lea.vmem %s1086_s0, %s943_s27  ;;  %v955_v6 = vld [vmem:[%s250_s30 + $0x8] sm:$0xff]   ;;  %v961_v15 = vld [vmem:[%s250_s30 + $0x10] sm:$0xff]   ;;  %s258_s14 = scalar_lea.vmem %s1090_s4, %s1093_s19 }
  0x11   : > { %893 = vmatprep.mubr.msk.bf16.mxu1 %vm310_vm1, %v954_v5  ;;  %v263_v7 = vld [vmem:[%s1040_s8] sm:$0xf]  ;;  %v264_v8 = vld [vmem:[%s1040_s8 + $0x4] sm:$0xf]  ;;  %v265_v9 = vld [vmem:[%s1040_s8 + $0x8] sm:$0xf]  ;;  %s261_s17 = scalar_lea.vmem %s1091_s5, %s1093_s19 }
  0x12   : > { %894 = vmatmul.mubr.msk.bf16.vlgmr.msra.gmra.mrb[0].mxu1 %vm310_vm1, %v955_v6  ;;  %v266_v10 = vld [vmem:[%s1040_s8 + $0xc] sm:$0xf]  ;;  %v813_v11 = vcombine.low %v263_v7, %v264_v8  ;;  %v824_v12 = vcombine.low %v264_v8, %v265_v9  ;;  %v268_v16 = vld [vmem:[%s1040_s8 + $0x14] sm:$0xf]  ;;  %v267_v17 = vld [vmem:[%s1040_s8 + $0x10] sm:$0xf] }
  0x13   : > { %v814_v13 = vcombine.low %v265_v9, %v266_v10  ;;  %922 = vmatpush3.bf16.msra.mxu1 %v430_v4  ;;  %897 = vmatprep.mubr.msk.bf16.mxu1 %vm310_vm1, %v961_v15  ;;  %v962_v18 = vld [vmem:[%s250_s30 + $0x18] sm:$0xff]   ;;  %v815_v19 = vcombine.low %v267_v17, %v268_v16  ;;  %v825_v21 = vcombine.low %v266_v10, %v267_v17  ;;  %v279_v25 = vld [vmem:[%s1040_s8 + $0x20] sm:$0xf] }
  0x14   : > { %903 = vmatprep.mubr.msk.bf16.mxu0 %vm310_vm1, %v813_v11  ;;  %v269_v20 = vld [vmem:[%s1040_s8 + $0x18] sm:$0xf]  ;;  %v270_v23 = vld [vmem:[%s1040_s8 + $0x1c] sm:$0xf] }
  0x15   : > { %904 = vmatmul.mubr.msk.bf16.vlgmr.msra.gmra.mrb[0].mxu0 %vm310_vm1, %v814_v13  ;;  %v826_v22 = vcombine.low %v268_v16, %v269_v20  ;;  %v816_v24 = vcombine.low %v269_v20, %v270_v23  ;;  %v827_v26 = vcombine.low %v270_v23, %v279_v25 }
  0x16   : > { %912 = vmatpush3.bf16.msra.mxu0 %v524_v14  ;;  %913 = vmatprep.mubr.msk.bf16.mxu0 %vm310_vm1, %v824_v12 }
  0x1a   : > { %898 = vmatmul.mubr.msk.bf16.gmra.mrb[4].mxu1 %vm310_vm1, %v962_v18 }
  0x1b   : > { %907 = vmatprep.mubr.msk.bf16.mxu1 %vm310_vm1, %v815_v19 }
  0x21   : > { %914 = vmatmul.mubr.msk.bf16.vlgmr.msra.gmra.mrb[0].mxu0 %vm310_vm1, %v825_v21 }
  0x22   : > { %917 = vmatprep.mubr.msk.bf16.mxu0 %vm310_vm1, %v826_v22 }
  0x26   : > { %908 = vmatmul.mubr.msk.bf16.vlgmr.msra.gmra.mrb[4].mxu1 %vm310_vm1, %v816_v24 }
  0x29   : > { %918 = vmatmul.mubr.msk.bf16.gmra.mrb[4].mxu0 %vm310_vm1, %v827_v26 }
  0xe5   : > { %v895_v27 = vpop.f32.mrb[0].mxu1 }
  0xe6   : > { %v361_v28 = vpop.f32.mrb[1].mxu1 }
  0xe7   : > { %v896_v29 = vpop.f32.mrb[2].mxu1 }
  0xe8   : > { %v364_v30 = vpop.f32.mrb[3].mxu1 }
  0xf4   : > { %v915_v31 = vpop.f32.mrb[0].mxu0 }
  0xf5   : > { %v923_v32 = vadd.f32 %v915_v31, %v895_v27  ;;  %v560_v33 = vpop.f32.mrb[1].mxu0 }
  0xf6   : > { %v924_v34 = vadd.f32 %v560_v33, %v361_v28  ;;  %v916_v35 = vpop.f32.mrb[2].mxu0 }
  0xf7   : > { %v925_v36 = vadd.f32 %v916_v35, %v896_v29  ;;  %v563_v37 = vpop.f32.mrb[3].mxu0  ;;  %v655_v47 = vmul.f32 %v923_v32, %v923_v32 }
  0xf8   : > { %v926_v38 = vadd.f32 %v563_v37, %v364_v30  ;;  %v653_v41 = vmul.f32 %v924_v34, %v924_v34 }
  0xf9   : > { %v861_v39 = vpack.c.bf16 %v925_v36, %v923_v32  ;;  %v909_v40 = vpop.f32.mrb[4].mxu1  ;;  %v656_v54 = vmul.f32 %v925_v36, %v925_v36 }
  0xfa   : > { %v856_v42 = vpack.c.bf16 %v926_v38, %v924_v34  ;;  %v639_v43 = vadd.f32 %v926_v38, %v924_v34  ;;  %v654_v44 = vmul.f32 %v926_v38, %v926_v38  ;;  %v482_v45 = vpop.f32.mrb[5].mxu1 }
  0xfb   : > { %873 = vst [vmem:[%s1069_s11 + $0x8] sm:$0xff] %v861_v39   ;;  %v910_v46 = vpop.f32.mrb[6].mxu1 }
  0xfc   : > { %857 = vst [vmem:[%s1069_s11] sm:$0xff] %v856_v42   ;;  %v640_v48 = vadd.f32 %v923_v32, %v639_v43  ;;  %v661_v49 = vadd.f32 %v654_v44, %v653_v41  ;;  %v919_v50 = vpop.f32.mrb[4].mxu0  ;;  %v485_v51 = vpop.f32.mrb[7].mxu1 }
  0xfd   : > { %v927_v52 = vadd.f32 %v919_v50, %v909_v40  ;;  %v576_v53 = vpop.f32.mrb[5].mxu0 }
  0xfe   : > { %v662_v55 = vadd.f32 %v661_v49, %v655_v47  ;;  %v928_v56 = vadd.f32 %v576_v53, %v482_v45  ;;  %v641_v57 = vadd.f32 %v925_v36, %v640_v48  ;;  %v920_v58 = vpop.f32.mrb[6].mxu0 }
  0xff   : > { %v929_v59 = vadd.f32 %v920_v58, %v910_v46  ;;  %v579_v60 = vpop.f32.mrb[7].mxu0  ;;  %v659_v6 = vmul.f32 %v927_v52, %v927_v52 }
 0x100   : > { %v642_v61 = vadd.f32 %v928_v56, %v641_v57  ;;  %v657_v62 = vmul.f32 %v928_v56, %v928_v56  ;;  %v663_v63 = vadd.f32 %v662_v55, %v656_v54  ;;  %v930_v0 = vadd.f32 %v579_v60, %v485_v51 }
 0x101   : > { %v871_v1 = vpack.c.bf16 %v929_v59, %v927_v52  ;;  %v660_v9 = vmul.f32 %v929_v59, %v929_v59 }
 0x102   : > { %v664_v2 = vadd.f32 %v663_v63, %v657_v62  ;;  %v866_v3 = vpack.c.bf16 %v930_v0, %v928_v56  ;;  %v643_v4 = vadd.f32 %v930_v0, %v642_v61  ;;  %v658_v5 = vmul.f32 %v930_v0, %v930_v0 }
 0x103   : > { %875 = vst [vmem:[%s1069_s11 + $0x18] sm:$0xff] %v871_v1  }
 0x104   : > { %874 = vst [vmem:[%s1069_s11 + $0x10] sm:$0xff] %v866_v3   ;;  %v644_v7 = vadd.f32 %v927_v52, %v643_v4  ;;  %v665_v8 = vadd.f32 %v664_v2, %v658_v5 }
 0x106   : > { %v645_v10 = vadd.f32 %v929_v59, %v644_v7  ;;  %v666_v11 = vadd.f32 %v665_v8, %v659_v6 }
 0x108   : > { %v646_v12 = vrot.slane %v645_v10, 4  ;;  %v667_v13 = vadd.f32 %v666_v11, %v660_v9 }
 0x10a   : > { %v647_v14 = vadd.f32 %v646_v12, %v645_v10  ;;  %v668_v15 = vrot.slane %v667_v13, 4 }
 0x10c   : > { %v648_v16 = vrot.slane %v647_v14, 2  ;;  %v669_v17 = vadd.f32 %v668_v15, %v667_v13 }
 0x10e   : > { %v649_v18 = vadd.f32 %v648_v16, %v647_v14  ;;  %v670_v19 = vrot.slane %v669_v17, 2 }
 0x110   : > { %v650_v20 = vrot.slane %v649_v18, 1  ;;  %v671_v21 = vadd.f32 %v670_v19, %v669_v17 }
 0x112   : > { %v651_v22 = vadd.f32 %v650_v20, %v649_v18  ;;  %v672_v23 = vrot.slane %v671_v21, 1 }
 0x114   : > { %652 = vst [vmem:[%s258_s14] sm:$0x1] %v651_v22  ;;  %v673_v24 = vadd.f32 %v672_v23, %v671_v21 }
 0x116   : > { %674 = vst [vmem:[%s261_s17] sm:$0x1] %v673_v24 }
 0x117 PF: > { %s16_s18 = sadd.s32 1, %s973_s18  }
 0x118   : > { %p13_p4 = scmp.ge.s32.totalorder %s16_s18, 4  }
 0x11a   :  { %15 = sbr.rel (!%p13_p4) target bundleno = 1 (0x1), region = 91 }

</bundles_post_ra>
